<compile_context>
chip_gen: v5e
topology: v5e:2x2
jax: 0.10.0
libtpu: 0.0.40
codegen_flags: <defaults>
</compile_context>

<pallas_src>
import functools

import jax
import jax.numpy as jnp
from jax.experimental import pallas as pl
from jax.experimental.pallas import tpu as pltpu


def _layer_norm_kernel(z_ref, g_ref, b_ref, o_ref, *, eps, d_hid, n_rows, tr):
    """Normalize a (TR, d_hid) slab along the last axis (unbiased std, like torch.std)."""
    z = z_ref[...].astype(jnp.float32)          # (TR, D)

    # Mask out-of-bounds tail rows (only compiled in when the last block is partial).
    if n_rows % tr != 0:
        row0 = pl.program_id(0) * tr
        rid = row0 + jax.lax.broadcasted_iota(jnp.int32, (tr, 1), 0)
        z = jnp.where(rid < n_rows, z, 0.0)     # masked rows stay finite; writes are clipped

    g = g_ref[...].astype(jnp.float32)          # (1, D)   a_2
    b = b_ref[...].astype(jnp.float32)          # (1, D)   b_2

    mu = jnp.mean(z, axis=-1, keepdims=True)    # (TR, 1)
    diff = z - mu
    # torch.std is unbiased by default: divide by (N - 1).  d_hid == 1 -> NaN, same as torch.
    inv_nm1 = (1.0 / float(d_hid - 1)) if d_hid > 1 else float("nan")
    var = jnp.sum(diff * diff, axis=-1, keepdims=True) * inv_nm1
    sigma = jnp.sqrt(var)
    inv = pl.reciprocal(sigma + eps, approx=False)   # exact; kernel is HBM-bound anyway

    o_ref[...] = (diff * inv * g + b).astype(o_ref.dtype)


def _choose_row_tile(n, d_hid, itemsize, *, target_bytes, vmem_budget_bytes):
    """Pick the per-step row count: byte-targeted, VMEM-capped, sublane-quantum aligned."""
    # Packed-sublane quantum of the dtype: 8 for 4B, 16 for 2B, 32 for 1B elements.
    quantum = max(8, 32 // itemsize)
    row_bytes = d_hid * itemsize

    # ~target_bytes of z per grid step amortizes the ~0.35us/step overhead (mem-bound roofline).
    tr = max(quantum, target_bytes // row_bytes)

    # Cap by VMEM: double-buffered (in + out) blocks plus ~3 tile-sized f32 temporaries in-body.
    per_row_vmem = 2 * 2 * row_bytes + 3 * d_hid * 4
    tr = min(tr, max(quantum, vmem_budget_bytes // per_row_vmem))

    # Keep >= 2 grid steps when there are enough rows (v7x: 2 TCs share the "parallel" axis).
    if n > 2 * quantum:
        half = pl.cdiv(n, 2)
        tr = min(tr, ((half + quantum - 1) // quantum) * quantum)

    # Align to the sublane quantum and never exceed the (quantum-rounded) row count.
    tr = max(quantum, (tr // quantum) * quantum)
    n_ceil = ((n + quantum - 1) // quantum) * quantum
    return min(tr, n_ceil)


def layer_normalization(z, a_2, b_2, *, eps=1e-3,
                        target_block_bytes=2 << 20, vmem_budget_bytes=24 << 20):
    """Pallas implementation of LayerNormalization.forward.

    z:   (..., d_hid)   (e.g. (B, S, d_hid))
    a_2: (d_hid,) scale parameter
    b_2: (d_hid,) bias parameter
    """
    # PyTorch module: `if z.size(1) == 1: return z`
    if z.ndim >= 2 and z.shape[1] == 1:
        return z

    d_hid = z.shape[-1]
    orig_shape = z.shape

    # Flatten all leading dims into one row axis; each row is normalized independently.
    z2 = z.reshape(-1, d_hid)
    n = z2.shape[0]
    itemsize = jnp.dtype(z2.dtype).itemsize

    tr = _choose_row_tile(n, d_hid, itemsize,
                          target_bytes=target_block_bytes,
                          vmem_budget_bytes=vmem_budget_bytes)
    grid = (pl.cdiv(n, tr),)        # partial last block; no pad / slice HBM copies

    g2 = a_2.reshape(1, d_hid)
    b2 = b_2.reshape(1, d_hid)

    z_spec = pl.BlockSpec((tr, d_hid), lambda i: (i, 0))
    p_spec = pl.BlockSpec((1, d_hid), lambda i: (0, 0))   # params: same block every step
    o_spec = pl.BlockSpec((tr, d_hid), lambda i: (i, 0))

    # Derived scoped-VMEM limit: never below the 32 MiB default, never above 48 MiB (v7x-safe).
    row_bytes = d_hid * itemsize
    footprint = (2 * 2 * tr * row_bytes          # double-buffered in + out blocks
                 + 2 * 2 * d_hid * itemsize      # double-buffered param blocks
                 + 4 * tr * d_hid * 4)           # in-body f32 temporaries (approx)
    vmem_limit = min(48 << 20, max(32 << 20, int(footprint * 1.25)))

    cost = pl.CostEstimate(
        flops=10 * n * d_hid,
        transcendentals=2 * n,                   # sqrt + reciprocal per row
        bytes_accessed=2 * n * d_hid * itemsize + 2 * d_hid * itemsize,
    )

    kernel = functools.partial(_layer_norm_kernel, eps=float(eps), d_hid=int(d_hid),
                               n_rows=int(n), tr=int(tr))

    out = pl.pallas_call(
        kernel,
        out_shape=jax.ShapeDtypeStruct((n, d_hid), z.dtype),
        grid=grid,
        in_specs=[z_spec, p_spec, p_spec],
        out_specs=o_spec,
        compiler_params=pltpu.CompilerParams(
            dimension_semantics=("parallel",),
            vmem_limit_bytes=vmem_limit,
        ),
        cost_estimate=cost,
    )(z2, g2, b2)

    return out.reshape(orig_shape)


def _reference(z, a_2, b_2, eps):
    mu = jnp.mean(z, axis=-1, keepdims=True)
    sigma = jnp.std(z, axis=-1, keepdims=True, ddof=1)   # unbiased, like torch.std
    return (z - mu) / (sigma + eps) * a_2 + b_2


if __name__ == "__main__":
    key = jax.random.PRNGKey(0)
    kz, kg, kb, kz2 = jax.random.split(key, 4)

    B, S, d_hid = 2, 8, 32
    eps = 1e-3

    z = jax.random.normal(kz, (B, S, d_hid), dtype=jnp.float32)
    # Module init is ones/zeros; use random affine params to exercise the full path.
    a_2 = 1.0 + 0.1 * jax.random.normal(kg, (d_hid,), dtype=jnp.float32)
    b_2 = 0.1 * jax.random.normal(kb, (d_hid,), dtype=jnp.float32)

    out = layer_normalization(z, a_2, b_2, eps=eps)
    jax.block_until_ready(out)
    ref = _reference(z, a_2, b_2, eps)
    assert jnp.allclose(out, ref, atol=1e-5, rtol=1e-5), float(jnp.max(jnp.abs(out - ref)))

    # Row count not divisible by the tile -> exercises the partial-last-block + mask path.
    zr = jax.random.normal(kz2, (3, 7, d_hid), dtype=jnp.float32)
    out_r = layer_normalization(zr, a_2, b_2, eps=eps)
    jax.block_until_ready(out_r)
    ref_r = _reference(zr, a_2, b_2, eps)
    assert jnp.allclose(out_r, ref_r, atol=1e-5, rtol=1e-5), float(jnp.max(jnp.abs(out_r - ref_r)))

    # Also check the `size(1) == 1` passthrough branch.
    z1 = jax.random.normal(kz, (B, 1, d_hid), dtype=jnp.float32)
    out1 = layer_normalization(z1, a_2, b_2, eps=eps)
    assert jnp.allclose(out1, z1)

    print("KERNEL_OK")
</pallas_src>

<mosaic_0001>
module attributes {stable_mosaic.version = 11 : i64} {
  func.func @_layer_norm_kernel(%arg0: i32, %arg1: memref<16x32xf32, #tpu.memory_space<vmem>>, %arg2: memref<1x32xf32, #tpu.memory_space<vmem>>, %arg3: memref<1x32xf32, #tpu.memory_space<vmem>>, %arg4: memref<16x32xf32, #tpu.memory_space<vmem>>) attributes {dimension_semantics = [#tpu.dimension_semantics<parallel>], iteration_bounds = array<i64: 1>, scalar_prefetch = 0 : i64, scratch_operands = 0 : i64, tpu.core_type = #tpu.core_type<tc>, window_params = [{transform_indices = @transform_0, window_bounds = array<i64: 16, 32>}, {pipeline_mode = #tpu.pipeline_mode<synchronous>, transform_indices = @transform_1, window_bounds = array<i64: 1, 32>}, {pipeline_mode = #tpu.pipeline_mode<synchronous>, transform_indices = @transform_2, window_bounds = array<i64: 1, 32>}, {transform_indices = @transform_3, window_bounds = array<i64: 16, 32>}]} {
    %c0 = arith.constant 0 : index
    %c0_0 = arith.constant 0 : index
    %0 = vector.load %arg1[%c0, %c0_0] : memref<16x32xf32, #tpu.memory_space<vmem>>, vector<16x32xf32>
    %c0_1 = arith.constant 0 : index
    %c0_2 = arith.constant 0 : index
    %1 = vector.load %arg2[%c0_1, %c0_2] : memref<1x32xf32, #tpu.memory_space<vmem>>, vector<1x32xf32>
    %c0_3 = arith.constant 0 : index
    %c0_4 = arith.constant 0 : index
    %2 = vector.load %arg3[%c0_3, %c0_4] : memref<1x32xf32, #tpu.memory_space<vmem>>, vector<1x32xf32>
    %cst = arith.constant dense<0.000000e+00> : vector<16xf32>
    %3 = vector.multi_reduction <add>, %0, %cst [1] : vector<16x32xf32> to vector<16xf32>
    %4 = vector.shape_cast %3 : vector<16xf32> to vector<16x1xf32>
    %cst_5 = arith.constant 3.200000e+01 : f32
    %5 = vector.broadcast %cst_5 : f32 to vector<16x1xf32>
    %6 = arith.divf %4, %5 : vector<16x1xf32>
    %7 = vector.broadcast %6 : vector<16x1xf32> to vector<16x32xf32>
    %8 = arith.subf %0, %7 : vector<16x32xf32>
    %9 = arith.mulf %8, %8 : vector<16x32xf32>
    %cst_6 = arith.constant dense<0.000000e+00> : vector<16xf32>
    %10 = vector.multi_reduction <add>, %9, %cst_6 [1] : vector<16x32xf32> to vector<16xf32>
    %11 = vector.shape_cast %10 : vector<16xf32> to vector<16x1xf32>
    %cst_7 = arith.constant 0.0322580636 : f32
    %12 = vector.broadcast %cst_7 : f32 to vector<16x1xf32>
    %13 = arith.mulf %11, %12 : vector<16x1xf32>
    %14 = math.sqrt %13 : vector<16x1xf32>
    %cst_8 = arith.constant 1.000000e-03 : f32
    %15 = vector.broadcast %cst_8 : f32 to vector<16x1xf32>
    %16 = arith.addf %14, %15 : vector<16x1xf32>
    %17 = tpu.reciprocal %16 : vector<16x1xf32> -> vector<16x1xf32>
    %18 = vector.broadcast %17 : vector<16x1xf32> to vector<16x32xf32>
    %19 = arith.mulf %8, %18 : vector<16x32xf32>
    %20 = vector.broadcast %1 : vector<1x32xf32> to vector<16x32xf32>
    %21 = arith.mulf %19, %20 : vector<16x32xf32>
    %22 = vector.broadcast %2 : vector<1x32xf32> to vector<16x32xf32>
    %23 = arith.addf %21, %22 : vector<16x32xf32>
    %c0_9 = arith.constant 0 : index
    %c0_10 = arith.constant 0 : index
    %24 = vector.load %arg4[%c0_9, %c0_10] : memref<16x32xf32, #tpu.memory_space<vmem>>, vector<16x32xf32>
    tpu.vector_store %arg4[%c0_9, %c0_10], %23 {strides = array<i32>} : memref<16x32xf32, #tpu.memory_space<vmem>>, vector<16x32xf32>,
    return
  }
  func.func @transform_0(%arg0: i32) -> (i32, i32) {
    %c0_i32 = arith.constant 0 : i32
    %c0_i32_0 = arith.constant 0 : i32
    return %arg0, %c0_i32 : i32, i32
  }
  func.func @transform_1(%arg0: i32) -> (i32, i32) {
    %c0_i32 = arith.constant 0 : i32
    %c0_i32_0 = arith.constant 0 : i32
    %c0_i32_1 = arith.constant 0 : i32
    return %c0_i32, %c0_i32_0 : i32, i32
  }
  func.func @transform_2(%arg0: i32) -> (i32, i32) {
    %c0_i32 = arith.constant 0 : i32
    %c0_i32_0 = arith.constant 0 : i32
    %c0_i32_1 = arith.constant 0 : i32
    return %c0_i32, %c0_i32_0 : i32, i32
  }
  func.func @transform_3(%arg0: i32) -> (i32, i32) {
    %c0_i32 = arith.constant 0 : i32
    %c0_i32_0 = arith.constant 0 : i32
    return %arg0, %c0_i32 : i32, i32
  }
}

</mosaic_0001>

<bundles_post_ra>
// kernel: tpu_custom_call.1
= control target key start
LH: loop header
LB: loop body
LE: loop exit
PB: predicated region body
PF: predicated region fallthrough
CT: control target
= control target key end

     0   :  { %8 = vsyncpa [#allocation3], 0  ;;  %s316_s0 = inlined_call_operand.hbm [shape: f32[16,32], index: 0, kind: input, shape index: {}]   ;;  %s317_s1 = inlined_call_operand.hbm [shape: f32[1,32], index: 1, kind: input, shape index: {}]   ;;  %s318_s2 = inlined_call_operand.vmem [shape: f32[1,32], index: 2, kind: input, shape index: {}]   ;;  %s319_s3 = inlined_call_operand.hbm [shape: f32[16,32], index: 3, kind: output, shape index: {}]  }
   0x1   :  { %9 = vsyncpa [#allocation6], 0 }
   0x2   :  { %10 = vsyncpa [#allocation4], 0  ;;  %s15_s14 = sshll.u32 %s316_s0, 4  ;;  %s261_s15 = smov [#allocation2]   ;;  %s16_s14 = int_to_ptr.hbm [resolvable:$true] %s15_s14 }
   0x3   :  { %s17_s16 = sshll.u32 %s261_s15, 4  ;;  %s29_s19 = sshll.u32 %s317_s1, 4  ;;  %s18_s16 = int_to_ptr.vmem [resolvable:$true] %s17_s16  ;;  %s30_s19 = int_to_ptr.hbm [resolvable:$true] %s29_s19 }
   0x4   :  { %s262_s20 = smov 128   ;;  %s263_s21 = smov 8  }
   0x5   :  { %23 = dma.hbm_to_vmem [thread:$0]  %s16_s14, 256, %s18_s16, [#allocation3], %s262_s20, %s262_s20, %s263_s21  }
   0x6   :  { %s264_s22 = smov [#allocation5]  }
   0x7   :  { %s31_s23 = sshll.u32 %s264_s22, 4  ;;  %s32_s23 = int_to_ptr.vmem [resolvable:$true] %s31_s23 }
   0x8   :  { %34 = dma.hbm_to_vmem [thread:$0]  %s30_s19, 16, %s32_s23, [#allocation6]  }
   0x9   :  { %255 = dma.done.wait [#allocation3], 256  }
   0xa   :  { %256 = vsyncadd [#allocation3], 4294967040 }
   0xb   :  { %257 = dma.done.wait [#allocation6], 16  }
   0xc   :  { %258 = vsyncadd [#allocation6], 4294967280  ;;  %vm49_vm0 = vcmask 261120   ;;  %v45_v0 = vld [vmem:[#allocation2] sm:$0xff]  ;;  %v46_v2 = vld [vmem:[#allocation2 + $0x8] sm:$0xff]  ;;  %v265_v4 = vmov 32.0  }
   0xd   :  { %v50_v1 = vsel %vm49_vm0, %v45_v0, 0.0  ;;  %v53_v3 = vsel %vm49_vm0, %v46_v2, 0.0  ;;  %173 = vrcp.f32 %v265_v4  ;;  %v171_v58 = vld [vmem:[#allocation5] ss:$0 sm:$0xff]  ;;  %v172_v62 = vld [vmem:[%s318_s2] ss:$0 sm:$0xff] }
   0xe   :  { %51 = vadd.xlane.f32.xlu0 %v50_v1  ;;  %s266_s24 = smov [#allocation7]   ;;  %s151_s27 = sshll.u32 %s319_s3, 4  ;;  %s152_s27 = int_to_ptr.hbm [resolvable:$true] %s151_s27 }
   0xf   :  { %s149_s25 = sshll.u32 %s266_s24, 4  ;;  %s150_s25 = int_to_ptr.vmem [resolvable:$true] %s149_s25 }
  0x13   :  { %v174_v5 = vpop.eup %173 }
  0x14   :  { %v57_v6 = vmul.f32 32.0, %v174_v5  ;;  %vm61_vm1 = vweird.f32 %v174_v5 }
  0x16   :  { %54 = vadd.xlane.f32.xlu0 %v53_v3  ;;  %v58_v7 = vsub.f32 1.0, %v57_v6 }
  0x18   :  { %v59_v8 = vmul.f32 %v174_v5, %v58_v7 }
  0x1a   :  { %v60_v9 = vadd.f32 %v174_v5, %v59_v8 }
  0x1c   :  { %v62_v10 = vsel %vm61_vm1, %v174_v5, %v60_v9 }
  0x81   :  { %v52_v11 = vpop.xlane.xlu0 %51 }
  0x82   :  { %v63_v12 = vmul.f32 %v62_v10, %v52_v11 }
  0x84   :  { %v65_v13 = vsub.f32 %v45_v0, %v63_v12 }
  0x86   :  { %v67_v14 = vmul.f32 %v65_v13, %v65_v13 }
  0x88   :  { %v69_v15 = vsel %vm49_vm0, %v67_v14, 0.0 }
  0x89   :  { %70 = vadd.xlane.f32.xlu1 %v69_v15  ;;  %v55_v16 = vpop.xlane.xlu0 %54 }
  0x8a   :  { %v64_v17 = vmul.f32 %v62_v10, %v55_v16 }
  0x8c   :  { %v299_v18 = vsub.f32 %v46_v2, %v64_v17 }
  0x8e   :  { %v68_v19 = vmul.f32 %v299_v18, %v299_v18 }
  0x90   :  { %v72_v20 = vsel %vm49_vm0, %v68_v19, 0.0 }
  0x91   :  { %73 = vadd.xlane.f32.xlu1 %v72_v20 }
  0xfc   :  { %v71_v21 = vpop.xlane.xlu1 %70 }
  0xfd   :  { %v75_v22 = vmul.f32 0.032258064, %v71_v21 }
  0xff   :  { %175 = vrsqrt.f32 %v75_v22  ;;  %vm84_vm2 = vcmp.eq.f32.partialorder %v75_v22, inf  ;;  %v87_v35 = vand.u32 2147483648, %v75_v22  ;;  %vm86_vm3 = vcmp.eq.f32.partialorder %v75_v22, 0.0 }
 0x104   :  { %v74_v23 = vpop.xlane.xlu1 %73 }
 0x105   :  { %v176_v24 = vpop.eup %175  ;;  %v76_v25 = vmul.f32 0.032258064, %v74_v23 }
 0x106   :  { %v78_v26 = vmul.f32 %v176_v24, %v75_v22 }
 0x107   :  { %177 = vrsqrt.f32 %v76_v25  ;;  %vm96_vm4 = vcmp.eq.f32.partialorder %v76_v25, inf  ;;  %v99_v43 = vand.u32 2147483648, %v76_v25  ;;  %vm98_vm5 = vcmp.eq.f32.partialorder %v76_v25, 0.0 }
 0x108   :  { %v79_v27 = vmul.f32 %v176_v24, %v78_v26 }
 0x10a   :  { %v80_v28 = vmul.f32 0.5, %v79_v27 }
 0x10c   :  { %v81_v29 = vsub.f32 1.5, %v80_v28 }
 0x10d   :  { %v178_v30 = vpop.eup %177 }
 0x10e   :  { %v82_v31 = vmul.f32 %v176_v24, %v81_v29  ;;  %v90_v32 = vmul.f32 %v178_v30, %v76_v25 }
 0x110   :  { %v83_v33 = vmul.f32 %v82_v31, %v75_v22  ;;  %v91_v34 = vmul.f32 %v178_v30, %v90_v32 }
 0x112   :  { %v85_v36 = vsel %vm84_vm2, %v75_v22, %v83_v33  ;;  %v92_v37 = vmul.f32 0.5, %v91_v34 }
 0x113   :  { %v88_v38 = vsel %vm86_vm3, %v87_v35, %v85_v36 }
 0x114   :  { %v101_v39 = vadd.f32 0.001, %v88_v38  ;;  %v93_v40 = vsub.f32 1.5, %v92_v37 }
 0x116   :  { %179 = vrcp.f32 %v101_v39  ;;  %v94_v41 = vmul.f32 %v178_v30, %v93_v40  ;;  %v114_v50 = vand.u32 2147483648, %v101_v39  ;;  %v112_v52 = vand.u32 2147483647, %v101_v39 }
 0x117   :  { %vm108_vm7 = vweird.f32 %v101_v39 }
 0x118   :  { %v95_v42 = vmul.f32 %v94_v41, %v76_v25  ;;  %v115_v55 = vor.u32 1.1754944e-38, %v114_v50  ;;  %vm113_vm9 = vcmp.eq.f32.partialorder %v112_v52, 8.507059e+37 }
 0x11a   :  { %v97_v44 = vsel %vm96_vm4, %v76_v25, %v95_v42 }
 0x11b   :  { %v100_v45 = vsel %vm98_vm5, %v99_v43, %v97_v44 }
 0x11c   :  { %v180_v46 = vpop.eup %179  ;;  %v102_v47 = vadd.f32 0.001, %v100_v45 }
 0x11d   :  { %v104_v48 = vmul.f32 %v180_v46, %v101_v39  ;;  %vm109_vm6 = vweird.f32 %v180_v46 }
 0x11e   :  { %181 = vrcp.f32 %v102_v47  ;;  %vm110_vm8 = vmor %vm108_vm7, %vm109_vm6  ;;  %v128_v63 = vand.u32 2147483648, %v102_v47  ;;  %v126_v1 = vand.u32 2147483647, %v102_v47  ;;  %vm122_vm11 = vweird.f32 %v102_v47 }
 0x11f   :  { %v105_v49 = vsub.f32 1.0, %v104_v48 }
 0x120   :  { %v129_v5 = vor.u32 1.1754944e-38, %v128_v63  ;;  %vm127_vm13 = vcmp.eq.f32.partialorder %v126_v1, 8.507059e+37 }
 0x121   :  { %v106_v51 = vmul.f32 %v180_v46, %v105_v49 }
 0x123   :  { %v107_v53 = vadd.f32 %v180_v46, %v106_v51 }
 0x124   :  { %v182_v54 = vpop.eup %181 }
 0x125   :  { %v111_v56 = vsel %vm110_vm8, %v180_v46, %v107_v53  ;;  %v118_v57 = vmul.f32 %v182_v54, %v102_v47  ;;  %vm123_vm10 = vweird.f32 %v182_v54 }
 0x126   :  { %v116_v59 = vsel %vm113_vm9, %v115_v55, %v111_v56  ;;  %vm124_vm12 = vmor %vm122_vm11, %vm123_vm10 }
 0x127   :  { %v119_v60 = vsub.f32 1.0, %v118_v57  ;;  %v131_v61 = vmul.f32 %v116_v59, %v65_v13 }
 0x129   :  { %v120_v0 = vmul.f32 %v182_v54, %v119_v60  ;;  %v136_v2 = vmul.f32 %v171_v58, %v131_v61 }
 0x12b   :  { %v121_v3 = vadd.f32 %v182_v54, %v120_v0  ;;  %v141_v4 = vadd.f32 %v172_v62, %v136_v2 }
 0x12d   :  { %v125_v6 = vsel %vm124_vm12, %v182_v54, %v121_v3  ;;  %143 = vst.msk [vmem:[#allocation7] sm:$0xff] %vm49_vm0, %v141_v4 }
 0x12e   :  { %v130_v7 = vsel %vm127_vm13, %v129_v5, %v125_v6 }
 0x12f   :  { %v132_v8 = vmul.f32 %v130_v7, %v299_v18 }
 0x131   :  { %v137_v9 = vmul.f32 %v171_v58, %v132_v8 }
 0x133   :  { %v142_v10 = vadd.f32 %v172_v62, %v137_v9 }
 0x135   :  { %144 = vst.msk [vmem:[#allocation7 + $0x8] sm:$0xff] %vm49_vm0, %v142_v10 }
 0x136   :  { %157 = dma.vmem_to_hbm [thread:$0]  %s150_s25, 256, %s152_s27, [#allocation4], %s262_s20, %s262_s20, %s263_s21  }
 0x137   :  { %259 = dma.done.wait [#allocation4], 256  }
 0x138   :  { %260 = vsyncadd [#allocation4], 4294967040 }
 0x139   :  { %162 = vsyncpa [#allocation3], 1 }
 0x13a   :  { %163 = vsyncpa [#allocation6], 1 }
 0x13b   :  { %164 = vsyncpa [#allocation4], 1 }

</bundles_post_ra>
